<compile_context>
chip_gen: v7x
topology: tpu7x:2x2x1
jax: 0.10.0
libtpu: 0.0.40
codegen_flags: <defaults>
</compile_context>

<pallas_src>
import jax
import jax.numpy as jnp
from jax.experimental import pallas as pl
from jax.experimental.pallas import tpu as pltpu

_LANE = 128


def _broadcast_rows_kernel(emb_ref, out_ref):
    # emb_ref: (1, PHp)  lane-dense flattened embedding table (constant block
    #                    index -> DMA'd into VMEM once, not per step).
    # out_ref: (TB, PHp) TB batch rows of the repeated embeddings.
    # Per-step fill is a sublane broadcast on the VPU; it is fully hidden
    # behind the output writeback DMA (store-bound kernel).
    out_ref[...] = jnp.broadcast_to(emb_ref[...], out_ref.shape)


def code_prompt_forward(
    prompt_embeddings: jax.Array,
    batch_size: int,
    *,
    target_block_bytes: int = 1 * 1024 * 1024,   # ~1 MiB output blocks
    min_pallas_out_bytes: int = 256 * 1024,      # below this, let XLA fuse it
    force_pallas: bool = False,
):
    """Pallas equivalent of CodePrompt.forward(batch_size).

    prompt_embeddings: [prompt_num, hidden_size] (the nn.Embedding weight;
        looking up indices [0..prompt_num) is the table itself).
    Returns:
        (prompt_embeddings_out [batch, prompt_num, hidden],
         prompt_mask           [batch, prompt_num])
    """
    P, H = prompt_embeddings.shape
    B = int(batch_size)
    dtype = prompt_embeddings.dtype
    itemsize = jnp.dtype(dtype).itemsize

    # torch.ones(batch_size, prompt_num) -> compile-time constant.
    prompt_mask = jnp.ones((B, P), jnp.float32)

    out_bytes = B * P * H * itemsize
    if not force_pallas and out_bytes < min_pallas_out_bytes:
        # Tiny output: materializing via a custom call only adds launch +
        # pipeline overhead; XLA can fuse the broadcast into the consumer.
        emb_out = jnp.broadcast_to(prompt_embeddings[None, :, :], (B, P, H))
        return emb_out, prompt_mask

    # ---- lane-dense flattened (and, if needed, padded) table -------------
    PH = P * H
    PHp = ((PH + _LANE - 1) // _LANE) * _LANE          # multiple of 128 lanes
    flat_emb = prompt_embeddings.reshape(1, PH)
    if PHp != PH:
        flat_emb = jnp.pad(flat_emb, ((0, 0), (0, PHp - PH)))

    row_bytes = PHp * itemsize

    # ---- choose TB = batch rows per output block --------------------------
    # dtype-native sublane multiple: 8 (f32), 16 (bf16/f16), 32 (int8/fp8)
    sub = max(8, 32 // itemsize)

    TB = max(1, target_block_bytes // row_bytes)
    TB = max(sub, (TB // sub) * sub)                   # round down to sublane mult
    TB = min(TB, B)

    # Keep >= 2 grid steps for non-trivial outputs so the "parallel" axis can
    # shard across v7x's 2 TensorCores (neutral on v5e/v6e's single TC).
    if out_bytes > 4 * 1024 * 1024 and TB >= B:
        half = ((B // 2) // sub) * sub
        if half >= sub:
            TB = half

    if TB != B and TB % 8 != 0:
        # (8,128) constraint: block sublane dim must be a multiple of 8 unless
        # it equals the full array dim.
        TB = B

    grid = (pl.cdiv(B, TB),)

    # ---- explicit VMEM accounting (2 buffers per BlockSpec) ---------------
    out_block_bytes = TB * row_bytes
    in_block_bytes = row_bytes
    vmem_limit = 2 * out_block_bytes + 2 * in_block_bytes + (2 << 20)  # +2 MiB headroom

    cost = pl.CostEstimate(
        flops=0,
        transcendentals=0,
        bytes_accessed=B * PHp * itemsize + PHp * itemsize,
    )

    emb_flat_out = pl.pallas_call(
        _broadcast_rows_kernel,
        out_shape=jax.ShapeDtypeStruct((B, PHp), dtype),
        grid_spec=pltpu.PrefetchScalarGridSpec(
            num_scalar_prefetch=0,
            grid=grid,
            in_specs=[
                # Full (tiny) table; constant index_map -> no re-DMA per step.
                pl.BlockSpec((1, PHp), lambda b: (0, 0)),
            ],
            out_specs=pl.BlockSpec((TB, PHp), lambda b: (b, 0)),
        ),
        compiler_params=pltpu.CompilerParams(
            dimension_semantics=("parallel",),
            vmem_limit_bytes=int(vmem_limit),
        ),
        cost_estimate=cost,
    )(flat_emb)

    if PHp != PH:
        emb_flat_out = emb_flat_out[:, :PH]
    emb_out = emb_flat_out.reshape(B, P, H)
    return emb_out, prompt_mask


def _reference(prompt_weight, batch_size):
    P, H = prompt_weight.shape
    ref_emb = jnp.broadcast_to(prompt_weight[None, :, :], (batch_size, P, H))
    ref_mask = jnp.ones((batch_size, P), jnp.float32)
    return ref_emb, ref_mask


if __name__ == "__main__":
    key = jax.random.PRNGKey(0)
    k1, k2 = jax.random.split(key)

    # Case 1: module-consistent small shapes (prompt_num=8, hidden_size=32,
    # batch=2); PH = 256 is already lane-aligned.  Force the Pallas path so
    # the kernel is exercised even though the output is tiny.
    prompt_num, hidden_size, batch_size = 8, 32, 2
    w1 = jax.random.normal(k1, (prompt_num, hidden_size), dtype=jnp.float32)
    emb_out, mask = code_prompt_forward(w1, batch_size, force_pallas=True)
    emb_out = jax.block_until_ready(emb_out)
    mask = jax.block_until_ready(mask)
    ref_emb, ref_mask = _reference(w1, batch_size)
    assert emb_out.shape == (batch_size, prompt_num, hidden_size)
    assert mask.shape == (batch_size, prompt_num)
    assert jnp.allclose(emb_out, ref_emb)
    assert jnp.allclose(mask, ref_mask)

    # Case 2: exercises the lane-padding path (PH = 5*20 = 100 -> padded to
    # 128) and a partial last batch block.
    prompt_num2, hidden_size2, batch_size2 = 5, 20, 3
    w2 = jax.random.normal(k2, (prompt_num2, hidden_size2), dtype=jnp.float32)
    emb_out2, mask2 = code_prompt_forward(w2, batch_size2, force_pallas=True)
    emb_out2 = jax.block_until_ready(emb_out2)
    mask2 = jax.block_until_ready(mask2)
    ref_emb2, ref_mask2 = _reference(w2, batch_size2)
    assert emb_out2.shape == (batch_size2, prompt_num2, hidden_size2)
    assert mask2.shape == (batch_size2, prompt_num2)
    assert jnp.allclose(emb_out2, ref_emb2)
    assert jnp.allclose(mask2, ref_mask2)

    print("KERNEL_OK")
</pallas_src>

<mosaic_0001>
module attributes {stable_mosaic.version = 11 : i64} {
  func.func @_broadcast_rows_kernel(%arg0: i32, %arg1: memref<1x256xf32, #tpu.memory_space<vmem>>, %arg2: memref<2x256xf32, #tpu.memory_space<vmem>>) attributes {dimension_semantics = [#tpu.dimension_semantics<parallel>], iteration_bounds = array<i64: 1>, scalar_prefetch = 0 : i64, scratch_operands = 0 : i64, tpu.core_type = #tpu.core_type<tc>, window_params = [{pipeline_mode = #tpu.pipeline_mode<synchronous>, transform_indices = @transform_0, window_bounds = array<i64: 1, 256>}, {transform_indices = @transform_1, window_bounds = array<i64: 2, 256>}]} {
    %c0 = arith.constant 0 : index
    %c0_0 = arith.constant 0 : index
    %0 = vector.load %arg1[%c0, %c0_0] : memref<1x256xf32, #tpu.memory_space<vmem>>, vector<1x256xf32>
    %1 = vector.shape_cast %0 : vector<1x256xf32> to vector<1x256xf32>
    %2 = vector.broadcast %1 : vector<1x256xf32> to vector<2x256xf32>
    %c0_1 = arith.constant 0 : index
    %c0_2 = arith.constant 0 : index
    %3 = vector.load %arg2[%c0_1, %c0_2] : memref<2x256xf32, #tpu.memory_space<vmem>>, vector<2x256xf32>
    tpu.vector_store %arg2[%c0_1, %c0_2], %2 {strides = array<i32>} : memref<2x256xf32, #tpu.memory_space<vmem>>, vector<2x256xf32>,
    return
  }
  func.func @transform_0(%arg0: i32) -> (i32, i32) {
    %c0_i32 = arith.constant 0 : i32
    %c0_i32_0 = arith.constant 0 : i32
    %c0_i32_1 = arith.constant 0 : i32
    return %c0_i32, %c0_i32_0 : i32, i32
  }
  func.func @transform_1(%arg0: i32) -> (i32, i32) {
    %c0_i32 = arith.constant 0 : i32
    %c0_i32_0 = arith.constant 0 : i32
    return %arg0, %c0_i32 : i32, i32
  }
}

</mosaic_0001>

<bundles_post_ra>
// kernel: tpu_custom_call.1
= control target key start
LH: loop header
LB: loop body
LE: loop exit
PB: predicated region body
PF: predicated region fallthrough
CT: control target
= control target key end

     0   :  { %6 = vsyncpa [#allocation3], 0  ;;  %s143_s0 = inlined_call_operand.hbm [shape: f32[1,256], index: 0, kind: input, shape index: {}]   ;;  %s144_s1 = inlined_call_operand.hbm [shape: f32[2,256], index: 1, kind: output, shape index: {}]  }
   0x1   :  { %7 = vsyncpa [#allocation4], 0  ;;  %s107_s6 = smov [#allocation2]   ;;  %s59_s10 = scalar_lea.hbm %s143_s0, 32 }
   0x2   :  { %s14_s7 = sshll.u32 %s107_s6, 4  ;;  %p60_p0 = scmp.ne.s32.totalorder %s143_s0, %s59_s10  ;;  %s15_s7 = int_to_ptr.vmem [resolvable:$true] %s14_s7 }
   0x3   :  { %p63_p1 = scmp.lt.u32.totalorder %s59_s10, %s143_s0 }
   0x5   :  { %p65_p2 = pnand %p63_p1, %p60_p0 }
   0x7   :  { %68 = shalt.err (!%p65_p2)
}
   0x8   :  { %s69_s15 = scalar_lea.vmem %s15_s7, 32  ;;  %p74_p4 = scmp.lt.s32.totalorder %s15_s7, %s15_s7 }
   0x9   :  { %p70_p3 = scmp.ne.s32.totalorder %s15_s7, %s69_s15  ;;  %p75_p5 = scmp.lt.s32.totalorder %s69_s15, %s69_s15 }
   0xb   :  { %p76_p6 = por %p75_p5, %p74_p4 }
   0xd   :  { %p77_p7 = pnand %p76_p6, %p70_p3 }
   0xf   :  { %80 = shalt.err (!%p77_p7)
}
  0x10   :  { %17 = dma.hbm_to_vmem [thread:$0]  %s143_s0, 32, %s15_s7, [#allocation3]  }
  0x11   :  { %103 = dma.done.wait [#allocation3], 32  }
  0x12   :  { %104 = vsyncadd [#allocation3], 4294967264  ;;  %v23_v0 = vlaneseq  ;;  %v21_v4 = vld [vmem:[#allocation2] sm:$0x3]  ;;  %s108_s18 = smov [#allocation5]  }
  0x13   :  { %s47_s19 = sshll.u32 %s108_s18, 4  ;;  %s48_s19 = int_to_ptr.vmem [resolvable:$true] %s47_s19 }
  0x14   :  { %v24_v1 = vshrl.u32 %v23_v0, 7  ;;  %s81_s20 = scalar_lea.vmem %s48_s19, 64  ;;  %p86_p9 = scmp.lt.s32.totalorder %s48_s19, %s48_s19 }
  0x15   :  { %p82_p8 = scmp.ne.s32.totalorder %s48_s19, %s81_s20  ;;  %p87_p10 = scmp.lt.s32.totalorder %s81_s20, %s81_s20 }
  0x16   :  { %v25_v2 = vsub.s32 0, %v24_v1  ;;  %v29_v3 = vsub.s32 1, %v24_v1 }
  0x17   :  { %p88_p11 = por %p87_p10, %p86_p9 }
  0x18   :  { %v26_v5 = vrot.slane %v21_v4, %v25_v2  ;;  %v30_v6 = vrot.slane %v21_v4, %v29_v3 }
  0x19   :  { %p89_p12 = pnand %p88_p11, %p82_p8 }
  0x1a   :  { %v31_v7 = vcombine.low %v26_v5, %v30_v6 }
  0x1c   :  { %56 = vst.sshfl [vmem:[#allocation5] sm:$0x33 pattern:$0x76325410] %v31_v7 }
  0x1d   :  { %92 = shalt.err (!%p89_p12)
}
  0x1e   :  { %s93_s22 = scalar_lea.hbm %s144_s1, 64 }
  0x1f   :  { %p94_p13 = scmp.ne.s32.totalorder %s144_s1, %s93_s22  ;;  %p97_p0 = scmp.lt.u32.totalorder %s93_s22, %s144_s1 }
  0x21   :  { %p99_p1 = pnand %p97_p0, %p94_p13 }
  0x23   :  { %102 = shalt.err (!%p99_p1)
}
  0x24   :  { %50 = dma.vmem_to_hbm [thread:$0]  %s48_s19, 64, %s144_s1, [#allocation4]  }
  0x25   :  { %105 = dma.done.wait [#allocation4], 64  }
  0x26   :  { %106 = vsyncadd [#allocation4], 4294967232 }
  0x27   :  { %54 = vsyncpa [#allocation3], 1 }
  0x28   :  { %55 = vsyncpa [#allocation4], 1 }

</bundles_post_ra>
